<compile_context>
chip_gen: v6e
topology: v6e:2x2x1
jax: 0.10.0
libtpu: 0.0.40
codegen_flags: <defaults>
</compile_context>

<pallas_src>
import functools

import jax
import jax.numpy as jnp
from jax.experimental import pallas as pl
from jax.experimental.pallas import tpu as pltpu


# ---------------------------------------------------------------------------
# Fused Pallas kernel: conv1 + conv2 + flatten + 3-layer MLP head.
# ---------------------------------------------------------------------------
def _critic_kernel(col1_ref, state_ref,
                   w1m_ref, b1_ref,
                   w2_ref, b2_ref,
                   fc1w_ref, fc1b_ref,
                   fc2w_ref, fc2b_ref,
                   fc3w_ref, fc3b_ref,
                   o_ref, *, tile_b, w1_out, h2_out, w2_out):
    f32 = jnp.float32
    bf16 = jnp.bfloat16

    # --- conv1 (5x5, stride 2) as one bf16 matmul + f32 bias + ReLU ----------
    # col1 rows are (i1, j1, b_local); columns (c, ki, kj) match w1m's rows.
    y1 = jnp.dot(col1_ref[...], w1m_ref[...], preferred_element_type=f32)
    y1 = jnp.maximum(y1 + b1_ref[...], 0.0)              # [R1*tile_b, 16] f32

    # --- conv2 (3x3, stride 2): in-kernel im2col via aligned row slices ------
    # Because rows are (spatial, batch), every tap at output position (i2, j2)
    # is a contiguous, sublane-aligned slice of tile_b rows of y1.
    pos_blocks = []
    for i2 in range(h2_out):
        for j2 in range(w2_out):
            taps = []
            for ki in range(3):
                for kj in range(3):
                    r1 = (2 * i2 + ki) * w1_out + (2 * j2 + kj)
                    taps.append(y1[r1 * tile_b:(r1 + 1) * tile_b, :])
            pos_blocks.append(jnp.concatenate(taps, axis=-1))   # [tile_b, 144]
    gathered = jnp.concatenate(pos_blocks, axis=0)              # [R2*tile_b, 144]

    # One K=144 MXU pass for all taps / channels.
    y2 = jnp.dot(gathered.astype(bf16), w2_ref[...], preferred_element_type=f32)
    y2 = jnp.maximum(y2 + b2_ref[...], 0.0)               # [R2*tile_b, 32] f32

    # --- flatten to a lane-dense [tile_b, R2*32] slab (order (r2, c2)) -------
    # The PyTorch NCHW flatten permutation is folded into fc1w at prep time.
    r2_total = h2_out * w2_out
    feat = jnp.concatenate(
        [y2[r * tile_b:(r + 1) * tile_b, :] for r in range(r2_total)], axis=-1)
    x = jnp.concatenate([feat, state_ref[...]], axis=-1)   # [tile_b, R2*32 + S]

    # --- fc1 + ReLU (single matmul, cnn + state fused) ------------------------
    h1 = jnp.dot(x.astype(bf16), fc1w_ref[...], preferred_element_type=f32)
    h1 = jnp.maximum(h1 + fc1b_ref[...], 0.0)              # [tile_b, 64]

    # --- fc2 + ReLU ------------------------------------------------------------
    h2 = jnp.dot(h1.astype(bf16), fc2w_ref[...], preferred_element_type=f32)
    h2 = jnp.maximum(h2 + fc2b_ref[...], 0.0)              # [tile_b, 64]

    # --- fc3 (N=1): VPU multiply + lane reduce, not a 1-wide MXU pass ----------
    v = jnp.sum(h2 * fc3w_ref[...], axis=1, keepdims=True) + fc3b_ref[...]
    o_ref[...] = v                                          # [tile_b, 1]


# ---------------------------------------------------------------------------
# Host glue: im2col for conv1 (static strided slices; single XLA fusion).
# Rows are produced per batch-tile in (i1, j1, b_local) order so the in-kernel
# conv2 gather is pure contiguous row slices.
# ---------------------------------------------------------------------------
def im2col_conv1(x_nchw, kh, kw, stride, tile_b):
    B, C, H, W = x_nchw.shape
    Ho = (H - kh) // stride + 1
    Wo = (W - kw) // stride + 1
    cols = []
    for i in range(kh):
        for j in range(kw):
            cols.append(x_nchw[:, :, i:i + stride * Ho:stride,
                               j:j + stride * Wo:stride])     # [B, C, Ho, Wo]
    col = jnp.stack(cols, axis=2)                             # [B, C, 25, Ho, Wo]
    col = col.reshape(B, C * kh * kw, Ho * Wo)                # cols (c, ki, kj)
    col = jnp.transpose(col, (0, 2, 1))                       # [B, R1, K1]
    n_tiles = B // tile_b
    col = col.reshape(n_tiles, tile_b, Ho * Wo, C * kh * kw)
    col = jnp.transpose(col, (0, 2, 1, 3))                    # [n, R1, tile_b, K1]
    col = col.reshape(n_tiles * Ho * Wo * tile_b, C * kh * kw)
    return col, Ho, Wo


# ---------------------------------------------------------------------------
# Parameters: PyTorch-layout init + one-time kernel-layout folding.
# ---------------------------------------------------------------------------
def conv_out_dims(image_shape):
    _, h, w = image_shape
    oh1, ow1 = (h - 5) // 2 + 1, (w - 5) // 2 + 1
    oh2, ow2 = (oh1 - 3) // 2 + 1, (ow1 - 3) // 2 + 1
    return oh1, ow1, oh2, ow2


def init_critic_params(key, image_shape, state_dim):
    c, _, _ = image_shape
    _, _, oh2, ow2 = conv_out_dims(image_shape)
    cnn_out_dim = 32 * oh2 * ow2
    ks = jax.random.split(key, 10)
    n = lambda k, shape, s: (s * jax.random.normal(k, shape)).astype(jnp.float32)
    return {
        "conv1_w": n(ks[0], (16, c, 5, 5), 0.1),
        "conv1_b": n(ks[1], (16,), 0.1),
        "conv2_w": n(ks[2], (32, 16, 3, 3), 0.1),
        "conv2_b": n(ks[3], (32,), 0.1),
        # linear weights stored as [in, out]
        "fc1_w": n(ks[4], (cnn_out_dim + state_dim, 64), 0.1),
        "fc1_b": n(ks[5], (64,), 0.1),
        "fc2_w": n(ks[6], (64, 64), 0.1),
        "fc2_b": n(ks[7], (64,), 0.1),
        "fc3_w": n(ks[8], (64, 1), 0.1),
        "fc3_b": n(ks[9], (1,), 0.1),
    }


def prep_kernel_params(params, image_shape):
    """One-time folding of PyTorch layout conventions into kernel weights.
    MXU weights -> bf16; bias / VPU weights stay f32."""
    C1, C2 = 16, 32
    _, _, oh2, ow2 = conv_out_dims(image_shape)
    R2 = oh2 * ow2
    cnn_out = C2 * R2

    kp = {}
    # conv1 as matmul: [C*25, 16]
    kp["w1m"] = params["conv1_w"].reshape(C1, -1).T.astype(jnp.bfloat16)
    kp["b1"] = params["conv1_b"].reshape(1, C1).astype(jnp.float32)

    # conv2 tap-stacked weight: rows ordered (ki, kj, c1) -> [144, 32]
    w2 = params["conv2_w"]                                    # [32, 16, 3, 3]
    kp["w2"] = (jnp.transpose(w2, (2, 3, 1, 0))
                .reshape(9 * C1, C2).astype(jnp.bfloat16))
    kp["b2"] = params["conv2_b"].reshape(1, C2).astype(jnp.float32)

    # fc1: permute cnn rows from PyTorch's flatten order (c2-major, r2-minor)
    # to the kernel's lane-dense feat order (r2-major, c2-minor); keep the
    # state rows appended after (matches the in-kernel concat order).
    fc1 = params["fc1_w"]                                     # [cnn_out + S, 64]
    fc1_cnn = (fc1[:cnn_out].reshape(C2, R2, 64)
               .transpose(1, 0, 2).reshape(R2 * C2, 64))
    kp["fc1w"] = jnp.concatenate([fc1_cnn, fc1[cnn_out:]],
                                 axis=0).astype(jnp.bfloat16)
    kp["fc1b"] = params["fc1_b"].reshape(1, 64).astype(jnp.float32)

    kp["fc2w"] = params["fc2_w"].astype(jnp.bfloat16)
    kp["fc2b"] = params["fc2_b"].reshape(1, 64).astype(jnp.float32)
    kp["fc3w"] = params["fc3_w"].reshape(1, 64).astype(jnp.float32)  # VPU reduce
    kp["fc3b"] = params["fc3_b"].reshape(1, 1).astype(jnp.float32)
    return kp


# ---------------------------------------------------------------------------
# Fused forward
# ---------------------------------------------------------------------------
def critic_forward(kparams, image, state_vec, tile_b=8):
    """image: [B, C, H, W] (NCHW), state_vec: [B, state_dim] -> value [B]."""
    B = image.shape[0]
    assert B % tile_b == 0, "batch must be a multiple of the batch tile"
    n_tiles = B // tile_b

    col1, oh1, ow1 = im2col_conv1(image, 5, 5, 2, tile_b)
    col1 = col1.astype(jnp.bfloat16)                       # halve col1 DMA bytes
    oh2, ow2 = (oh1 - 3) // 2 + 1, (ow1 - 3) // 2 + 1
    R1, R2 = oh1 * ow1, oh2 * ow2
    K1 = col1.shape[1]
    S = state_vec.shape[1]
    state_vec = state_vec.astype(jnp.float32)

    weight_names = ("w1m", "b1", "w2", "b2",
                    "fc1w", "fc1b", "fc2w", "fc2b", "fc3w", "fc3b")
    weights = [kparams[name] for name in weight_names]

    def invariant_spec(arr):
        nd = arr.ndim
        return pl.BlockSpec(tuple(arr.shape), lambda m, _nd=nd: (0,) * _nd)

    in_specs = ([pl.BlockSpec((R1 * tile_b, K1), lambda m: (m, 0)),
                 pl.BlockSpec((tile_b, S), lambda m: (m, 0))]
                + [invariant_spec(w) for w in weights])

    kernel = functools.partial(_critic_kernel, tile_b=tile_b,
                               w1_out=ow1, h2_out=oh2, w2_out=ow2)

    # Real cost (no artificial gather terms).
    flops = int(2 * B * R1 * K1 * 16            # conv1
                + 2 * B * R2 * (9 * 16) * 32    # conv2 (K=144 matmul)
                + 2 * B * (R2 * 32 + S) * 64    # fc1
                + 2 * B * 64 * 64               # fc2
                + 2 * B * 64)                   # fc3
    bytes_accessed = int(col1.size * col1.dtype.itemsize
                         + state_vec.size * 4
                         + sum(int(w.size) * w.dtype.itemsize for w in weights)
                         + B * 4)

    out = pl.pallas_call(
        kernel,
        out_shape=jax.ShapeDtypeStruct((B, 1), jnp.float32),
        grid=(n_tiles,),
        in_specs=in_specs,
        out_specs=pl.BlockSpec((tile_b, 1), lambda m: (m, 0)),
        compiler_params=pltpu.CompilerParams(
            dimension_semantics=("parallel",)),
        cost_estimate=pl.CostEstimate(
            flops=flops, transcendentals=0, bytes_accessed=bytes_accessed),
    )(col1, state_vec, *weights)
    return out[:, 0]


# Pure-JAX f32 reference for correctness (takes the PyTorch-layout params).
def critic_forward_ref(params, image, state_vec):
    y = jax.lax.conv_general_dilated(
        image, params["conv1_w"], window_strides=(2, 2), padding="VALID",
        dimension_numbers=("NCHW", "OIHW", "NCHW"))
    y = jnp.maximum(y + params["conv1_b"][None, :, None, None], 0.0)
    y = jax.lax.conv_general_dilated(
        y, params["conv2_w"], window_strides=(2, 2), padding="VALID",
        dimension_numbers=("NCHW", "OIHW", "NCHW"))
    y = jnp.maximum(y + params["conv2_b"][None, :, None, None], 0.0)
    feat = y.reshape(y.shape[0], -1)
    x = jnp.concatenate([feat, state_vec], axis=1)
    h = jnp.maximum(x @ params["fc1_w"] + params["fc1_b"], 0.0)
    h = jnp.maximum(h @ params["fc2_w"] + params["fc2_b"], 0.0)
    return (h @ params["fc3_w"] + params["fc3_b"])[:, 0]


if __name__ == "__main__":
    B = 16                       # batch; tiled over the grid
    TILE_B = 8                   # (8,128)-friendly batch tile
    image_shape = (4, 16, 16)    # (C, H, W)
    state_dim = 8

    key = jax.random.PRNGKey(0)
    k_param, k_img, k_state = jax.random.split(key, 3)

    params = init_critic_params(k_param, image_shape, state_dim)
    image = jax.random.normal(k_img, (B, *image_shape), dtype=jnp.float32)
    state_vec = jax.random.normal(k_state, (B, state_dim), dtype=jnp.float32)

    # One-time layout folding (outside the forward / critical path).
    kparams = prep_kernel_params(params, image_shape)

    fwd = jax.jit(functools.partial(critic_forward, tile_b=TILE_B))
    value = jax.block_until_ready(fwd(kparams, image, state_vec))
    assert value.shape == (B,), value.shape

    ref = jax.block_until_ready(critic_forward_ref(params, image, state_vec))
    # bf16 MXU operands (f32 accumulation) -> slightly looser tolerance than f32.
    assert jnp.allclose(value, ref, rtol=5e-2, atol=5e-2), (value, ref)

    print("KERNEL_OK")
</pallas_src>

<mosaic_0001>
module attributes {stable_mosaic.version = 11 : i64} {
  func.func @_critic_kernel(%arg0: i32, %arg1: memref<288x100xbf16, #tpu.memory_space<vmem>>, %arg2: memref<8x8xf32, #tpu.memory_space<vmem>>, %arg3: memref<100x16xbf16, #tpu.memory_space<vmem>>, %arg4: memref<1x16xf32, #tpu.memory_space<vmem>>, %arg5: memref<144x32xbf16, #tpu.memory_space<vmem>>, %arg6: memref<1x32xf32, #tpu.memory_space<vmem>>, %arg7: memref<136x64xbf16, #tpu.memory_space<vmem>>, %arg8: memref<1x64xf32, #tpu.memory_space<vmem>>, %arg9: memref<64x64xbf16, #tpu.memory_space<vmem>>, %arg10: memref<1x64xf32, #tpu.memory_space<vmem>>, %arg11: memref<1x64xf32, #tpu.memory_space<vmem>>, %arg12: memref<1x1xf32, #tpu.memory_space<vmem>>, %arg13: memref<8x1xf32, #tpu.memory_space<vmem>>) attributes {dimension_semantics = [#tpu.dimension_semantics<parallel>], iteration_bounds = array<i64: 2>, scalar_prefetch = 0 : i64, scratch_operands = 0 : i64, tpu.core_type = #tpu.core_type<tc>, window_params = [{transform_indices = @transform_0, window_bounds = array<i64: 288, 100>}, {transform_indices = @transform_1, window_bounds = array<i64: 8, 8>}, {pipeline_mode = #tpu.pipeline_mode<synchronous>, transform_indices = @transform_2, window_bounds = array<i64: 100, 16>}, {pipeline_mode = #tpu.pipeline_mode<synchronous>, transform_indices = @transform_3, window_bounds = array<i64: 1, 16>}, {pipeline_mode = #tpu.pipeline_mode<synchronous>, transform_indices = @transform_4, window_bounds = array<i64: 144, 32>}, {pipeline_mode = #tpu.pipeline_mode<synchronous>, transform_indices = @transform_5, window_bounds = array<i64: 1, 32>}, {pipeline_mode = #tpu.pipeline_mode<synchronous>, transform_indices = @transform_6, window_bounds = array<i64: 136, 64>}, {pipeline_mode = #tpu.pipeline_mode<synchronous>, transform_indices = @transform_7, window_bounds = array<i64: 1, 64>}, {pipeline_mode = #tpu.pipeline_mode<synchronous>, transform_indices = @transform_8, window_bounds = array<i64: 64, 64>}, {pipeline_mode = #tpu.pipeline_mode<synchronous>, transform_indices = @transform_9, window_bounds = array<i64: 1, 64>}, {pipeline_mode = #tpu.pipeline_mode<synchronous>, transform_indices = @transform_10, window_bounds = array<i64: 1, 64>}, {pipeline_mode = #tpu.pipeline_mode<synchronous>, transform_indices = @transform_11, window_bounds = array<i64: 1, 1>}, {transform_indices = @transform_12, window_bounds = array<i64: 8, 1>}]} {
    %c0 = arith.constant 0 : index
    %c0_0 = arith.constant 0 : index
    %0 = vector.load %arg1[%c0, %c0_0] : memref<288x100xbf16, #tpu.memory_space<vmem>>, vector<288x100xbf16>
    %c0_1 = arith.constant 0 : index
    %c0_2 = arith.constant 0 : index
    %1 = vector.load %arg3[%c0_1, %c0_2] : memref<100x16xbf16, #tpu.memory_space<vmem>>, vector<100x16xbf16>
    %cst = arith.constant dense<0.000000e+00> : vector<288x16xf32>
    %2 = tpu.matmul %0, %1, %cst {dimension_numbers = #tpu.dot_dimension_numbers<[1], [0], [0], [1], [0, 0, 1, 1], [], []>} : vector<288x100xbf16>, vector<100x16xbf16>, vector<288x16xf32> -> vector<288x16xf32>
    %c0_3 = arith.constant 0 : index
    %c0_4 = arith.constant 0 : index
    %3 = vector.load %arg4[%c0_3, %c0_4] : memref<1x16xf32, #tpu.memory_space<vmem>>, vector<1x16xf32>
    %4 = vector.broadcast %3 : vector<1x16xf32> to vector<288x16xf32>
    %5 = arith.addf %2, %4 : vector<288x16xf32>
    %cst_5 = arith.constant 0.000000e+00 : f32
    %6 = vector.broadcast %cst_5 : f32 to vector<288x16xf32>
    %7 = arith.maximumf %5, %6 : vector<288x16xf32>
    %8 = vector.extract_strided_slice %7 {offsets = [0, 0], sizes = [8, 16], strides = [1, 1]} : vector<288x16xf32> to vector<8x16xf32>
    %9 = vector.extract_strided_slice %7 {offsets = [8, 0], sizes = [8, 16], strides = [1, 1]} : vector<288x16xf32> to vector<8x16xf32>
    %10 = vector.extract_strided_slice %7 {offsets = [16, 0], sizes = [8, 16], strides = [1, 1]} : vector<288x16xf32> to vector<8x16xf32>
    %11 = vector.extract_strided_slice %7 {offsets = [48, 0], sizes = [8, 16], strides = [1, 1]} : vector<288x16xf32> to vector<8x16xf32>
    %12 = vector.extract_strided_slice %7 {offsets = [56, 0], sizes = [8, 16], strides = [1, 1]} : vector<288x16xf32> to vector<8x16xf32>
    %13 = vector.extract_strided_slice %7 {offsets = [64, 0], sizes = [8, 16], strides = [1, 1]} : vector<288x16xf32> to vector<8x16xf32>
    %14 = vector.extract_strided_slice %7 {offsets = [96, 0], sizes = [8, 16], strides = [1, 1]} : vector<288x16xf32> to vector<8x16xf32>
    %15 = vector.extract_strided_slice %7 {offsets = [104, 0], sizes = [8, 16], strides = [1, 1]} : vector<288x16xf32> to vector<8x16xf32>
    %16 = vector.extract_strided_slice %7 {offsets = [112, 0], sizes = [8, 16], strides = [1, 1]} : vector<288x16xf32> to vector<8x16xf32>
    %17 = tpu.concatenate %8, %9, %10, %11, %12, %13, %14, %15, %16 in 1 : vector<8x16xf32>, vector<8x16xf32>, vector<8x16xf32>, vector<8x16xf32>, vector<8x16xf32>, vector<8x16xf32>, vector<8x16xf32>, vector<8x16xf32>, vector<8x16xf32> -> vector<8x144xf32>
    %18 = vector.extract_strided_slice %7 {offsets = [16, 0], sizes = [8, 16], strides = [1, 1]} : vector<288x16xf32> to vector<8x16xf32>
    %19 = vector.extract_strided_slice %7 {offsets = [24, 0], sizes = [8, 16], strides = [1, 1]} : vector<288x16xf32> to vector<8x16xf32>
    %20 = vector.extract_strided_slice %7 {offsets = [32, 0], sizes = [8, 16], strides = [1, 1]} : vector<288x16xf32> to vector<8x16xf32>
    %21 = vector.extract_strided_slice %7 {offsets = [64, 0], sizes = [8, 16], strides = [1, 1]} : vector<288x16xf32> to vector<8x16xf32>
    %22 = vector.extract_strided_slice %7 {offsets = [72, 0], sizes = [8, 16], strides = [1, 1]} : vector<288x16xf32> to vector<8x16xf32>
    %23 = vector.extract_strided_slice %7 {offsets = [80, 0], sizes = [8, 16], strides = [1, 1]} : vector<288x16xf32> to vector<8x16xf32>
    %24 = vector.extract_strided_slice %7 {offsets = [112, 0], sizes = [8, 16], strides = [1, 1]} : vector<288x16xf32> to vector<8x16xf32>
    %25 = vector.extract_strided_slice %7 {offsets = [120, 0], sizes = [8, 16], strides = [1, 1]} : vector<288x16xf32> to vector<8x16xf32>
    %26 = vector.extract_strided_slice %7 {offsets = [128, 0], sizes = [8, 16], strides = [1, 1]} : vector<288x16xf32> to vector<8x16xf32>
    %27 = tpu.concatenate %18, %19, %20, %21, %22, %23, %24, %25, %26 in 1 : vector<8x16xf32>, vector<8x16xf32>, vector<8x16xf32>, vector<8x16xf32>, vector<8x16xf32>, vector<8x16xf32>, vector<8x16xf32>, vector<8x16xf32>, vector<8x16xf32> -> vector<8x144xf32>
    %28 = vector.extract_strided_slice %7 {offsets = [96, 0], sizes = [8, 16], strides = [1, 1]} : vector<288x16xf32> to vector<8x16xf32>
    %29 = vector.extract_strided_slice %7 {offsets = [104, 0], sizes = [8, 16], strides = [1, 1]} : vector<288x16xf32> to vector<8x16xf32>
    %30 = vector.extract_strided_slice %7 {offsets = [112, 0], sizes = [8, 16], strides = [1, 1]} : vector<288x16xf32> to vector<8x16xf32>
    %31 = vector.extract_strided_slice %7 {offsets = [144, 0], sizes = [8, 16], strides = [1, 1]} : vector<288x16xf32> to vector<8x16xf32>
    %32 = vector.extract_strided_slice %7 {offsets = [152, 0], sizes = [8, 16], strides = [1, 1]} : vector<288x16xf32> to vector<8x16xf32>
    %33 = vector.extract_strided_slice %7 {offsets = [160, 0], sizes = [8, 16], strides = [1, 1]} : vector<288x16xf32> to vector<8x16xf32>
    %34 = vector.extract_strided_slice %7 {offsets = [192, 0], sizes = [8, 16], strides = [1, 1]} : vector<288x16xf32> to vector<8x16xf32>
    %35 = vector.extract_strided_slice %7 {offsets = [200, 0], sizes = [8, 16], strides = [1, 1]} : vector<288x16xf32> to vector<8x16xf32>
    %36 = vector.extract_strided_slice %7 {offsets = [208, 0], sizes = [8, 16], strides = [1, 1]} : vector<288x16xf32> to vector<8x16xf32>
    %37 = tpu.concatenate %28, %29, %30, %31, %32, %33, %34, %35, %36 in 1 : vector<8x16xf32>, vector<8x16xf32>, vector<8x16xf32>, vector<8x16xf32>, vector<8x16xf32>, vector<8x16xf32>, vector<8x16xf32>, vector<8x16xf32>, vector<8x16xf32> -> vector<8x144xf32>
    %38 = vector.extract_strided_slice %7 {offsets = [112, 0], sizes = [8, 16], strides = [1, 1]} : vector<288x16xf32> to vector<8x16xf32>
    %39 = vector.extract_strided_slice %7 {offsets = [120, 0], sizes = [8, 16], strides = [1, 1]} : vector<288x16xf32> to vector<8x16xf32>
    %40 = vector.extract_strided_slice %7 {offsets = [128, 0], sizes = [8, 16], strides = [1, 1]} : vector<288x16xf32> to vector<8x16xf32>
    %41 = vector.extract_strided_slice %7 {offsets = [160, 0], sizes = [8, 16], strides = [1, 1]} : vector<288x16xf32> to vector<8x16xf32>
    %42 = vector.extract_strided_slice %7 {offsets = [168, 0], sizes = [8, 16], strides = [1, 1]} : vector<288x16xf32> to vector<8x16xf32>
    %43 = vector.extract_strided_slice %7 {offsets = [176, 0], sizes = [8, 16], strides = [1, 1]} : vector<288x16xf32> to vector<8x16xf32>
    %44 = vector.extract_strided_slice %7 {offsets = [208, 0], sizes = [8, 16], strides = [1, 1]} : vector<288x16xf32> to vector<8x16xf32>
    %45 = vector.extract_strided_slice %7 {offsets = [216, 0], sizes = [8, 16], strides = [1, 1]} : vector<288x16xf32> to vector<8x16xf32>
    %46 = vector.extract_strided_slice %7 {offsets = [224, 0], sizes = [8, 16], strides = [1, 1]} : vector<288x16xf32> to vector<8x16xf32>
    %47 = tpu.concatenate %38, %39, %40, %41, %42, %43, %44, %45, %46 in 1 : vector<8x16xf32>, vector<8x16xf32>, vector<8x16xf32>, vector<8x16xf32>, vector<8x16xf32>, vector<8x16xf32>, vector<8x16xf32>, vector<8x16xf32>, vector<8x16xf32> -> vector<8x144xf32>
    %48 = tpu.concatenate %17, %27, %37, %47 in 0 : vector<8x144xf32>, vector<8x144xf32>, vector<8x144xf32>, vector<8x144xf32> -> vector<32x144xf32>
    %49 = arith.truncf %48 : vector<32x144xf32> to vector<32x144xbf16>
    %c0_6 = arith.constant 0 : index
    %c0_7 = arith.constant 0 : index
    %50 = vector.load %arg5[%c0_6, %c0_7] : memref<144x32xbf16, #tpu.memory_space<vmem>>, vector<144x32xbf16>
    %cst_8 = arith.constant dense<0.000000e+00> : vector<32x32xf32>
    %51 = tpu.matmul %49, %50, %cst_8 {dimension_numbers = #tpu.dot_dimension_numbers<[1], [0], [0], [1], [0, 0, 1, 1], [], []>} : vector<32x144xbf16>, vector<144x32xbf16>, vector<32x32xf32> -> vector<32x32xf32>
    %c0_9 = arith.constant 0 : index
    %c0_10 = arith.constant 0 : index
    %52 = vector.load %arg6[%c0_9, %c0_10] : memref<1x32xf32, #tpu.memory_space<vmem>>, vector<1x32xf32>
    %53 = vector.broadcast %52 : vector<1x32xf32> to vector<32x32xf32>
    %54 = arith.addf %51, %53 : vector<32x32xf32>
    %cst_11 = arith.constant 0.000000e+00 : f32
    %55 = vector.broadcast %cst_11 : f32 to vector<32x32xf32>
    %56 = arith.maximumf %54, %55 : vector<32x32xf32>
    %57 = vector.extract_strided_slice %56 {offsets = [0, 0], sizes = [8, 32], strides = [1, 1]} : vector<32x32xf32> to vector<8x32xf32>
    %58 = vector.extract_strided_slice %56 {offsets = [8, 0], sizes = [8, 32], strides = [1, 1]} : vector<32x32xf32> to vector<8x32xf32>
    %59 = vector.extract_strided_slice %56 {offsets = [16, 0], sizes = [8, 32], strides = [1, 1]} : vector<32x32xf32> to vector<8x32xf32>
    %60 = vector.extract_strided_slice %56 {offsets = [24, 0], sizes = [8, 32], strides = [1, 1]} : vector<32x32xf32> to vector<8x32xf32>
    %61 = tpu.concatenate %57, %58, %59, %60 in 1 : vector<8x32xf32>, vector<8x32xf32>, vector<8x32xf32>, vector<8x32xf32> -> vector<8x128xf32>
    %c0_12 = arith.constant 0 : index
    %c0_13 = arith.constant 0 : index
    %62 = vector.load %arg2[%c0_12, %c0_13] : memref<8x8xf32, #tpu.memory_space<vmem>>, vector<8x8xf32>
    %63 = tpu.concatenate %61, %62 in 1 : vector<8x128xf32>, vector<8x8xf32> -> vector<8x136xf32>
    %64 = arith.truncf %63 : vector<8x136xf32> to vector<8x136xbf16>
    %c0_14 = arith.constant 0 : index
    %c0_15 = arith.constant 0 : index
    %65 = vector.load %arg7[%c0_14, %c0_15] : memref<136x64xbf16, #tpu.memory_space<vmem>>, vector<136x64xbf16>
    %cst_16 = arith.constant dense<0.000000e+00> : vector<8x64xf32>
    %66 = tpu.matmul %64, %65, %cst_16 {dimension_numbers = #tpu.dot_dimension_numbers<[1], [0], [0], [1], [0, 0, 1, 1], [], []>} : vector<8x136xbf16>, vector<136x64xbf16>, vector<8x64xf32> -> vector<8x64xf32>
    %c0_17 = arith.constant 0 : index
    %c0_18 = arith.constant 0 : index
    %67 = vector.load %arg8[%c0_17, %c0_18] : memref<1x64xf32, #tpu.memory_space<vmem>>, vector<1x64xf32>
    %68 = vector.broadcast %67 : vector<1x64xf32> to vector<8x64xf32>
    %69 = arith.addf %66, %68 : vector<8x64xf32>
    %cst_19 = arith.constant 0.000000e+00 : f32
    %70 = vector.broadcast %cst_19 : f32 to vector<8x64xf32>
    %71 = arith.maximumf %69, %70 : vector<8x64xf32>
    %72 = arith.truncf %71 : vector<8x64xf32> to vector<8x64xbf16>
    %c0_20 = arith.constant 0 : index
    %c0_21 = arith.constant 0 : index
    %73 = vector.load %arg9[%c0_20, %c0_21] : memref<64x64xbf16, #tpu.memory_space<vmem>>, vector<64x64xbf16>
    %cst_22 = arith.constant dense<0.000000e+00> : vector<8x64xf32>
    %74 = tpu.matmul %72, %73, %cst_22 {dimension_numbers = #tpu.dot_dimension_numbers<[1], [0], [0], [1], [0, 0, 1, 1], [], []>} : vector<8x64xbf16>, vector<64x64xbf16>, vector<8x64xf32> -> vector<8x64xf32>
    %c0_23 = arith.constant 0 : index
    %c0_24 = arith.constant 0 : index
    %75 = vector.load %arg10[%c0_23, %c0_24] : memref<1x64xf32, #tpu.memory_space<vmem>>, vector<1x64xf32>
    %76 = vector.broadcast %75 : vector<1x64xf32> to vector<8x64xf32>
    %77 = arith.addf %74, %76 : vector<8x64xf32>
    %cst_25 = arith.constant 0.000000e+00 : f32
    %78 = vector.broadcast %cst_25 : f32 to vector<8x64xf32>
    %79 = arith.maximumf %77, %78 : vector<8x64xf32>
    %c0_26 = arith.constant 0 : index
    %c0_27 = arith.constant 0 : index
    %80 = vector.load %arg11[%c0_26, %c0_27] : memref<1x64xf32, #tpu.memory_space<vmem>>, vector<1x64xf32>
    %81 = vector.broadcast %80 : vector<1x64xf32> to vector<8x64xf32>
    %82 = arith.mulf %79, %81 : vector<8x64xf32>
    %cst_28 = arith.constant dense<0.000000e+00> : vector<8xf32>
    %83 = vector.multi_reduction <add>, %82, %cst_28 [1] : vector<8x64xf32> to vector<8xf32>
    %84 = vector.shape_cast %83 : vector<8xf32> to vector<8x1xf32>
    %c0_29 = arith.constant 0 : index
    %c0_30 = arith.constant 0 : index
    %85 = vector.load %arg12[%c0_29, %c0_30] : memref<1x1xf32, #tpu.memory_space<vmem>>, vector<1x1xf32>
    %86 = vector.broadcast %85 : vector<1x1xf32> to vector<8x1xf32>
    %87 = arith.addf %84, %86 : vector<8x1xf32>
    %c0_31 = arith.constant 0 : index
    %c0_32 = arith.constant 0 : index
    %88 = vector.load %arg13[%c0_31, %c0_32] : memref<8x1xf32, #tpu.memory_space<vmem>>, vector<8x1xf32>
    tpu.vector_store %arg13[%c0_31, %c0_32], %87 {strides = array<i32>} : memref<8x1xf32, #tpu.memory_space<vmem>>, vector<8x1xf32>,
    return
  }
  func.func @transform_0(%arg0: i32) -> (i32, i32) {
    %c0_i32 = arith.constant 0 : i32
    %c0_i32_0 = arith.constant 0 : i32
    return %arg0, %c0_i32 : i32, i32
  }
  func.func @transform_1(%arg0: i32) -> (i32, i32) {
    %c0_i32 = arith.constant 0 : i32
    %c0_i32_0 = arith.constant 0 : i32
    return %arg0, %c0_i32 : i32, i32
  }
  func.func @transform_2(%arg0: i32) -> (i32, i32) {
    %c0_i32 = arith.constant 0 : i32
    %c0_i32_0 = arith.constant 0 : i32
    %c0_i32_1 = arith.constant 0 : i32
    return %c0_i32, %c0_i32_0 : i32, i32
  }
  func.func @transform_3(%arg0: i32) -> (i32, i32) {
    %c0_i32 = arith.constant 0 : i32
    %c0_i32_0 = arith.constant 0 : i32
    %c0_i32_1 = arith.constant 0 : i32
    return %c0_i32, %c0_i32_0 : i32, i32
  }
  func.func @transform_4(%arg0: i32) -> (i32, i32) {
    %c0_i32 = arith.constant 0 : i32
    %c0_i32_0 = arith.constant 0 : i32
    %c0_i32_1 = arith.constant 0 : i32
    return %c0_i32, %c0_i32_0 : i32, i32
  }
  func.func @transform_5(%arg0: i32) -> (i32, i32) {
    %c0_i32 = arith.constant 0 : i32
    %c0_i32_0 = arith.constant 0 : i32
    %c0_i32_1 = arith.constant 0 : i32
    return %c0_i32, %c0_i32_0 : i32, i32
  }
  func.func @transform_6(%arg0: i32) -> (i32, i32) {
    %c0_i32 = arith.constant 0 : i32
    %c0_i32_0 = arith.constant 0 : i32
    %c0_i32_1 = arith.constant 0 : i32
    return %c0_i32, %c0_i32_0 : i32, i32
  }
  func.func @transform_7(%arg0: i32) -> (i32, i32) {
    %c0_i32 = arith.constant 0 : i32
    %c0_i32_0 = arith.constant 0 : i32
    %c0_i32_1 = arith.constant 0 : i32
    return %c0_i32, %c0_i32_0 : i32, i32
  }
  func.func @transform_8(%arg0: i32) -> (i32, i32) {
    %c0_i32 = arith.constant 0 : i32
    %c0_i32_0 = arith.constant 0 : i32
    %c0_i32_1 = arith.constant 0 : i32
    return %c0_i32, %c0_i32_0 : i32, i32
  }
  func.func @transform_9(%arg0: i32) -> (i32, i32) {
    %c0_i32 = arith.constant 0 : i32
    %c0_i32_0 = arith.constant 0 : i32
    %c0_i32_1 = arith.constant 0 : i32
    return %c0_i32, %c0_i32_0 : i32, i32
  }
  func.func @transform_10(%arg0: i32) -> (i32, i32) {
    %c0_i32 = arith.constant 0 : i32
    %c0_i32_0 = arith.constant 0 : i32
    %c0_i32_1 = arith.constant 0 : i32
    return %c0_i32, %c0_i32_0 : i32, i32
  }
  func.func @transform_11(%arg0: i32) -> (i32, i32) {
    %c0_i32 = arith.constant 0 : i32
    %c0_i32_0 = arith.constant 0 : i32
    %c0_i32_1 = arith.constant 0 : i32
    return %c0_i32, %c0_i32_0 : i32, i32
  }
  func.func @transform_12(%arg0: i32) -> (i32, i32) {
    %c0_i32 = arith.constant 0 : i32
    %c0_i32_0 = arith.constant 0 : i32
    return %arg0, %c0_i32 : i32, i32
  }
}

</mosaic_0001>

<bundles_post_ra>
// kernel: critic_forward.1
= control target key start
LH: loop header
LB: loop body
LE: loop exit
PB: predicated region body
PF: predicated region fallthrough
CT: control target
= control target key end

     0   :  { %s1864_s23 = smov 0   ;;  %s2156_s0 = inlined_call_operand.vmem [shape: bf16[576,100], index: 0, kind: input, shape index: {}]   ;;  %s2157_s1 = inlined_call_operand.vmem [shape: f32[16,8], index: 1, kind: input, shape index: {}]   ;;  %s2158_s2 = inlined_call_operand.vmem [shape: bf16[100,16], index: 2, kind: input, shape index: {}]   ;;  %s2159_s3 = inlined_call_operand.vmem [shape: f32[1,16], index: 3, kind: input, shape index: {}]   ;;  %s2160_s4 = inlined_call_operand.vmem [shape: bf16[144,32], index: 4, kind: input, shape index: {}]   ;;  %s2161_s5 = inlined_call_operand.vmem [shape: f32[1,32], index: 5, kind: input, shape index: {}]   ;;  %s2162_s6 = inlined_call_operand.vmem [shape: bf16[136,64], index: 6, kind: input, shape index: {}]   ;;  %s2163_s7 = inlined_call_operand.vmem [shape: f32[1,64], index: 7, kind: input, shape index: {}]   ;;  %s2164_s8 = inlined_call_operand.vmem [shape: bf16[64,64], index: 8, kind: input, shape index: {}]   ;;  %s2165_s9 = inlined_call_operand.vmem [shape: f32[1,64], index: 9, kind: input, shape index: {}]   ;;  %s2166_s10 = inlined_call_operand.vmem [shape: f32[1,64], index: 10, kind: input, shape index: {}]   ;;  %s2167_s11 = inlined_call_operand.<no memory space> [shape: f32[1,1], index: 11, kind: input, shape index: {}]   ;;  %s2168_s12 = inlined_call_operand.vmem [shape: f32[16,1], index: 12, kind: output, shape index: {}]  }
   0x1   :  { %v17_v0 = vstv %s2167_s11 }
   0x2   :  { %18 = vst [vmem:[#allocation2] sm:$0x1] %v17_v0 }
   0x3 LB: > { %s1870_s24 = sadd.s32 4294967295, %s1784_s23   ;;  %p1469_p0 = scmp.ge.s32.totalorder %s1784_s23, 1  ;;  %s1784_s23 = sphi %s1864_s23, %s24_s23  }
   0x4   : > { %p374_p1 = scmp.lt.s32.totalorder %s1784_s23, 3 }
   0x6   : > { %p375_p2 = pnand %p1469_p0, %p374_p1 }
   0x7   : > { %s419_s28 = smul.u32 (!%p375_p2), 36, %s1870_s24  ;;  %s1787_s25 = smov (!%p375_p2), 16  }
   0x8   : > { %378 = sbr.rel (%p375_p2) target bundleno = 1274 (0x4fa), region = 68  ;;  %s1788_s27 = smov (!%p375_p2), 32  }
   0x9   : > { %p420_p3 = scmp.lt.s32.totalorder (!%p375_p2), %s419_s28, 71  ;;  %s1789_s14 = smov (!%p375_p2), 48  }
   0xa   : > { %s1791_s16 = smov (!%p375_p2), 64   ;;  %s1792_s17 = smov (!%p375_p2), 96  }
   0xb   : > { %s1793_s19 = smov (!%p375_p2), 112   ;;  %p425_p4 = scmp.lt.s32.totalorder (!%p375_p2), %s1870_s24, 1 }
   0xd   : > { %v1731_v1 = vld [vmem:[%s2158_s2 + $0x30] ss:$0 sps:$4 sm:$0x33]   ;;  %vm674_vm0 = vcmask 1041408   ;;  %v1732_v2 = vld [vmem:[%s2158_s2 + $0x28] sm:$0xff]   ;;  %v1733_v4 = vld [vmem:[%s2158_s2 + $0x20] sm:$0xff]  }
   0xe   : > { %1642 = vmatprep.subr.msk.bf16.mxu0 %vm674_vm0, %v1731_v1  ;;  %v676_v3 = vsel %vm674_vm0, %v1731_v1, 0  ;;  %s2170_s28 = smov (!%p420_p3, %s419_s28), 71  ;;  %v1734_v5 = vld [vmem:[%s2158_s2 + $0x18] sm:$0xff]   ;;  %vm619_vm1 = vcmask 818176   ;;  %v1735_v7 = vld [vmem:[%s2158_s2 + $0x10] sm:$0xff]   ;;  %v1736_v8 = vld [vmem:[%s2158_s2 + $0x8] sm:$0xff]  }
   0xf   : > { %1581 = vmatpush3.bf16.msra.mxu0 %v676_v3  ;;  %s1470_s15 = sshll.u32 %s2170_s28, 2  ;;  %v1737_v9 = vld [vmem:[%s2158_s2] sm:$0xff]   ;;  %v1754_v25 = vld [vmem:[%s2160_s4 + $0x38] sm:$0xff]   ;;  %v1786_v26 = vmov 0   ;;  %v1755_v27 = vld [vmem:[%s2160_s4 + $0x30] sm:$0xff]   ;;  %vm897_vm2 = vcmask 130048  }
  0x10   : > { %1582 = vmatprep.subr.bf16.mxu0 %v1732_v2  ;;  %s1890_s18 = scalar_lea.vmem %s2156_s0, %s1470_s15  ;;  %1100 = vmatprep.subr.bf16.mxu1 %v1786_v26  ;;  %v1756_v29 = vld [vmem:[%s2160_s4 + $0x28] sm:$0xff]   ;;  %v1948_v30 = vld [vmem:[%s2159_s3] ss:$0 sm:$0xff]  ;;  %v1758_v37 = vld [vmem:[%s2160_s4 + $0x18] sm:$0xff]   ;;  %s1790_s15 = smov 80   ;;  %vm899_vm3 = vcmask 261120  }
  0x11   : > { %v1738_v6 = vld [vmem:[%s1890_s18] sm:$0xff]   ;;  %v1739_v10 = vld [vmem:[%s1890_s18 + $0x8] sm:$0xff]   ;;  %v1740_v11 = vld [vmem:[%s1890_s18 + $0x10] sm:$0xff]   ;;  %1101 = vmatpush1.bf16.msra.mxu1 %v1754_v25  ;;  %vm901_vm4 = vcmask 392192   ;;  %vm903_vm5 = vcmask 523264   ;;  %vm905_vm6 = vcmask 654336  }
  0x12   : > { %1594 = vmatprep.mubr.msk.bf16.mxu0 %vm619_vm1, %v1738_v6  ;;  %v1741_v12 = vld [vmem:[%s1890_s18 + $0x18] sm:$0xff]   ;;  %v1742_v13 = vld [vmem:[%s1890_s18 + $0x20] sm:$0xff]   ;;  %v1743_v14 = vld [vmem:[%s1890_s18 + $0x28] sm:$0xff]   ;;  %1102 = vmatprep.subr.bf16.mxu1 %v1786_v26  ;;  %vm907_vm7 = vcmask 785408   ;;  %vm909_vm8 = vcmask 916480   ;;  %s2172_s24 = smov (!%p425_p4, %s1870_s24), 1 }
  0x13   : > { %1583 = vmatpush3.bf16.msra.mxu0 %v1732_v2  ;;  %v1744_v15 = vld [vmem:[%s1890_s18 + $0x30] sm:$0xff]   ;;  %v1745_v16 = vld [vmem:[%s1890_s18 + $0x38] sm:$0xff]   ;;  %v1746_v17 = vld [vmem:[%s1890_s18 + $0x40] sm:$0xff]   ;;  %vm1250_vm9 = vcmask 1043456   ;;  %vm1246_vm10 = vcmask 64512   ;;  %vm1795_vm11 = vmmov 0  }
  0x14   : > { %1584 = vmatprep.subr.bf16.mxu0 %v1733_v4  ;;  %v1747_v18 = vld [vmem:[%s1890_s18 + $0x48] sm:$0xff]   ;;  %v1748_v19 = vld [vmem:[%s1890_s18 + $0x50] sm:$0xff]   ;;  %v1749_v20 = vld [vmem:[%s1890_s18 + $0x58] sm:$0xff]   ;;  %vm1398_vm12 = vcmask 7168  }
  0x15   : > { %v1750_v21 = vld [vmem:[%s1890_s18 + $0x60] sm:$0xff]   ;;  %v1751_v22 = vld [vmem:[%s1890_s18 + $0x68] sm:$0xff]   ;;  %v1752_v23 = vld [vmem:[%s1890_s18 + $0x70] sm:$0xff]   ;;  %1103 = vmatpush1.bf16.msra.mxu1 %v1755_v27 }
  0x16   : > { %v1753_v24 = vld [vmem:[%s1890_s18 + $0x78] sm:$0xff]   ;;  %1104 = vmatprep.subr.bf16.mxu1 %v1786_v26  ;;  %v1757_v34 = vld [vmem:[%s2160_s4 + $0x20] sm:$0xff]   ;;  %v1759_v47 = vld [vmem:[%s2160_s4 + $0x10] sm:$0xff]  }
  0x17   : > { %1585 = vmatpush3.bf16.msra.mxu0 %v1733_v4  ;;  %v1760_v53 = vld [vmem:[%s2160_s4 + $0x8] sm:$0xff]   ;;  %v1761_v59 = vld [vmem:[%s2160_s4] sm:$0xff]  }
  0x18   : > { %1586 = vmatprep.subr.bf16.mxu0 %v1734_v5 }
  0x19   : > { %1105 = vmatpush1.bf16.msra.mxu1 %v1756_v29 }
  0x1a   : > { %1106 = vmatprep.subr.bf16.mxu1 %v1786_v26 }
  0x1b   : > { %1587 = vmatpush3.bf16.msra.mxu0 %v1734_v5  ;;  %v1762_v5 = vld [vmem:[%s2160_s4 + $0x40] sm:$0xff]  }
  0x1c   : > { %1588 = vmatprep.subr.bf16.mxu0 %v1735_v7 }
  0x1d   : > { %1107 = vmatpush1.bf16.msra.mxu1 %v1757_v34 }
  0x1e   : > { %1108 = vmatprep.subr.bf16.mxu1 %v1786_v26 }
  0x1f   : > { %1589 = vmatpush3.bf16.msra.mxu0 %v1735_v7 }
  0x20   : > { %1590 = vmatprep.subr.bf16.mxu0 %v1736_v8 }
  0x21   : > { %1109 = vmatpush1.bf16.msra.mxu1 %v1758_v37 }
  0x22   : > { %1110 = vmatprep.subr.bf16.mxu1 %v1786_v26 }
  0x23   : > { %1591 = vmatpush3.bf16.msra.mxu0 %v1736_v8 }
  0x24   : > { %1592 = vmatprep.subr.bf16.mxu0 %v1737_v9 }
  0x25   : > { %1111 = vmatpush1.bf16.msra.mxu1 %v1759_v47 }
  0x26   : > { %1112 = vmatprep.subr.bf16.mxu1 %v1786_v26 }
  0x27   : > { %1593 = vmatpush3.bf16.msra.mxu0 %v1737_v9 }
  0x29   : > { %1113 = vmatpush1.bf16.msra.mxu1 %v1760_v53 }
  0x2a   : > { %1595 = vmatmul.mubr.msk.bf16.vlgmr.msra.gmra.mxu0 %vm619_vm1, %v1739_v10  ;;  %1114 = vmatprep.subr.bf16.mxu1 %v1786_v26 }
  0x2b   : > { %1598 = vmatprep.mubr.msk.bf16.mxu0 %vm619_vm1, %v1740_v11 }
  0x2d   : > { %1115 = vmatpush1.bf16.msra.mxu1 %v1761_v59 }
  0x2e   : > { %1130 = vmatprep.subr.bf16.mxu1 %v1786_v26 }
  0x31   : > { %1131 = vmatpush2.bf16.msra.mxu1 %v1762_v5 }
  0x32   : > { %1599 = vmatmul.mubr.msk.bf16.gmra.mxu0 %vm619_vm1, %v1741_v12  ;;  %1254 = vmatprep.subr.bf16.mxu1 %v1786_v26 }
  0x33   : > { %1602 = vmatprep.mubr.msk.bf16.mxu0 %vm619_vm1, %v1742_v13 }
  0x3a   : > { %1603 = vmatmul.mubr.msk.bf16.gmra.mxu0 %vm619_vm1, %v1743_v14 }
  0x3b   : > { %1606 = vmatprep.mubr.msk.bf16.mxu0 %vm619_vm1, %v1744_v15 }
  0x42   : > { %1607 = vmatmul.mubr.msk.bf16.gmra.mxu0 %vm619_vm1, %v1745_v16 }
  0x43   : > { %1610 = vmatprep.mubr.msk.bf16.mxu0 %vm619_vm1, %v1746_v17 }
  0x4a   : > { %1611 = vmatmul.mubr.msk.bf16.gmra.mxu0 %vm619_vm1, %v1747_v18 }
  0x4b   : > { %1614 = vmatprep.mubr.msk.bf16.mxu0 %vm619_vm1, %v1748_v19 }
  0x52   : > { %1615 = vmatmul.mubr.msk.bf16.gmra.mxu0 %vm619_vm1, %v1749_v20 }
  0x53   : > { %1618 = vmatprep.mubr.msk.bf16.mxu0 %vm619_vm1, %v1750_v21 }
  0x5a   : > { %1619 = vmatmul.mubr.msk.bf16.gmra.mxu0 %vm619_vm1, %v1751_v22 }
  0x5b   : > { %1622 = vmatprep.mubr.msk.bf16.mxu0 %vm619_vm1, %v1752_v23 }
  0x62   : > { %1623 = vmatmul.mubr.msk.bf16.gmra.mxu0 %vm619_vm1, %v1753_v24 }
  0xea   : > { %v1596_v28 = vpop.f32.mrf.mxu0 }
  0xeb   : > { %v1964_v40 = vadd.f32 %v1596_v28, %v1948_v30 }
  0xec   : > { %v712_v31 = vpop.f32.mrf.mxu0 }
  0xed   : > { %v1951_v32 = vadd.f32 %v1948_v30, %v712_v31  ;;  %v846_v48 = vmax.f32 %v1964_v40, 0.0 }
  0xee   : > { %v1597_v33 = vpop.f32.mrf.mxu0 }
  0xef   : > { %v724_v35 = vadd.f32 %v1597_v33, %v1948_v30 }
  0xf0   : > { %v715_v36 = vpop.f32.mrf.mxu0 }
  0xf1   : > { %v716_v38 = vadd.f32 %v1948_v30, %v715_v36  ;;  %v847_v41 = vmax.f32 %v724_v35, 0.0 }
  0xf2   : > { %v1600_v39 = vpop.f32.mrf.mxu0 }
  0xf3   : > { %v845_v42 = vmax.f32 %v716_v38, 0.0  ;;  %v736_v54 = vadd.f32 %v1600_v39, %v1948_v30 }
  0xf4   : > { %v728_v43 = vpop.f32.mrf.mxu0 }
  0xf5   : > { %v729_v44 = vadd.f32 %v1948_v30, %v728_v43  ;;  %v1661_v45 = vpack.i.bf16 %v847_v41, %v845_v42  ;;  %v849_v60 = vmax.f32 %v736_v54, 0.0 }
  0xf6   : > { %v1601_v46 = vpop.f32.mrf.mxu0 }
  0xf7   : > { %v848_v49 = vmax.f32 %v729_v44, 0.0  ;;  %1662 = vrot.lane.b32.xlu0 %v1661_v45, %s1787_s25  ;;  %v739_v61 = vadd.f32 %v1601_v46, %v1948_v30 }
  0xf8   : > { %v731_v50 = vpop.f32.mrf.mxu0 }
  0xf9   : > { %v1666_v51 = vpack.i.bf16 %v848_v49, %v846_v48  ;;  %v850_v6 = vmax.f32 %v739_v61, 0.0 }
  0xfa   : > { %v1604_v52 = vpop.f32.mrf.mxu0 }
  0xfb   : > { %v752_v55 = vadd.f32 %v1604_v52, %v1948_v30  ;;  %1667 = vrot.lane.b32.xlu0 %v1666_v51, %s1788_s27 }
  0xfc   : > { %v743_v56 = vpop.f32.mrf.mxu0 }
  0xfd   : > { %v744_v57 = vadd.f32 %v1948_v30, %v743_v56  ;;  %v853_v62 = vmax.f32 %v752_v55, 0.0 }
  0xfe   : > { %v1605_v58 = vpop.f32.mrf.mxu0 }
  0xff   : > { %v851_v63 = vmax.f32 %v744_v57, 0.0 }
 0x100   : > { %v746_v0 = vpop.f32.mrf.mxu0 }
 0x101   : > { %v1676_v1 = vpack.i.bf16 %v853_v62, %v851_v63  ;;  %v747_v2 = vadd.f32 %v1948_v30, %v746_v0  ;;  %v1671_v3 = vpack.i.bf16 %v851_v63, %v849_v60 }
 0x102   : > { %v1608_v4 = vpop.f32.mrf.mxu0 }
 0x103   : > { %v852_v7 = vmax.f32 %v747_v2, 0.0  ;;  %v767_v8 = vadd.f32 %v1608_v4, %v1948_v30  ;;  %1672 = vrot.lane.b32.xlu1 %v1671_v3, %s1789_s14  ;;  %1677 = vrot.lane.b32.xlu0 %v1676_v1, %s1790_s15 }
 0x104   : > { %v758_v9 = vpop.f32.mrf.mxu0 }
 0x105   : > { %v1681_v10 = vpack.i.bf16 %v852_v7, %v850_v6  ;;  %v1997_v11 = vadd.f32 %v1948_v30, %v758_v9  ;;  %v2000_v13 = vmax.f32 %v767_v8, 0.0 }
 0x106   : > { %v1609_v12 = vpop.f32.mrf.mxu0 }
 0x107   : > { %v854_v14 = vmax.f32 %v1997_v11, 0.0  ;;  %v770_v15 = vadd.f32 %v1609_v12, %v1948_v30  ;;  %1682 = vrot.lane.b32.xlu1 %v1681_v10, %s1791_s16 }
 0x108   : > { %v761_v16 = vpop.f32.mrf.mxu0 }
 0x109   : > { %v1686_v17 = vpack.i.bf16 %v2000_v13, %v854_v14  ;;  %v762_v18 = vadd.f32 %v1948_v30, %v761_v16  ;;  %v857_v20 = vmax.f32 %v770_v15, 0.0 }
 0x10a   : > { %v1612_v19 = vpop.f32.mrf.mxu0 }
 0x10b   : > { %v855_v21 = vmax.f32 %v762_v18, 0.0  ;;  %1687 = vrot.lane.b32.xlu1 %v1686_v17, %s1792_s17  ;;  %v782_v34 = vadd.f32 %v1612_v19, %v1948_v30 }
 0x10c   : > { %v774_v22 = vpop.f32.mrf.mxu0 }
 0x10d   : > { %v1696_v23 = vpack.i.bf16 %v857_v20, %v855_v21  ;;  %v775_v24 = vadd.f32 %v1948_v30, %v774_v22  ;;  %v859_v38 = vmax.f32 %v782_v34, 0.0  ;;  %v844_v20 = vmax.f32 %v1951_v32, 0.0 }
 0x10e   : > { %v1613_v25 = vpop.f32.mrf.mxu0 }
 0x10f   : > { %v858_v27 = vmax.f32 %v775_v24, 0.0  ;;  %1697 = vrot.lane.b32.xlu1 %v1696_v23, %s1787_s25  ;;  %1692 = vrot.lane.b32.xlu0 %v1696_v23, %s1793_s19  ;;  %v785_v39 = vadd.f32 %v1613_v25, %v1948_v30 }
 0x110   : > { %v777_v28 = vpop.f32.mrf.mxu0 }
 0x111   : > { %v1701_v29 = vpack.i.bf16 %v858_v27, %v2000_v13  ;;  %v1012_v31 = vpack.c.bf16 %v858_v27, %v2000_v13  ;;  %v860_v47 = vmax.f32 %v785_v39, 0.0 }
 0x112   : > { %v1616_v33 = vpop.f32.mrf.mxu0 }
 0x113   : > { %1527 = vmatprep.mubr.msk.bf16.mxu1 %vm897_vm2, %v1012_v31  ;;  %1702 = vrot.lane.b32.xlu0 %v1701_v29, %s1788_s27  ;;  %v798_v41 = vadd.f32 %v1616_v33, %v1948_v30 }
 0x114   : > { %v789_v35 = vpop.f32.mrf.mxu0 }
 0x115   : > { %v790_v36 = vadd.f32 %v1948_v30, %v789_v35  ;;  %v863_v49 = vmax.f32 %v798_v41, 0.0 }
 0x116   : > { %v1617_v37 = vpop.f32.mrf.mxu0 }
 0x117   : > { %v861_v42 = vmax.f32 %v790_v36, 0.0 }
 0x118   : > { %v792_v43 = vpop.f32.mrf.mxu0 }
 0x119   : > { %v1706_v44 = vpack.i.bf16 %v861_v42, %v859_v38  ;;  %v793_v45 = vadd.f32 %v1948_v30, %v792_v43  ;;  %v1711_v53 = vpack.i.bf16 %v863_v49, %v861_v42 }
 0x11a   : > { %v1620_v46 = vpop.f32.mrf.mxu0 }
 0x11b   : > { %v862_v50 = vmax.f32 %v793_v45, 0.0  ;;  %v813_v51 = vadd.f32 %v1620_v46, %v1948_v30  ;;  %1707 = vrot.lane.b32.xlu1 %v1706_v44, %s1789_s14 }
 0x11c   : > { %v804_v52 = vpop.f32.mrf.mxu0 }
 0x11d   : > { %v1716_v54 = vpack.i.bf16 %v862_v50, %v860_v47  ;;  %v805_v55 = vadd.f32 %v1948_v30, %v804_v52  ;;  %v866_v57 = vmax.f32 %v813_v51, 0.0 }
 0x11e   : > { %v1621_v56 = vpop.f32.mrf.mxu0 }
 0x11f   : > { %v864_v58 = vmax.f32 %v805_v55, 0.0  ;;  %v816_v59 = vadd.f32 %v1621_v56, %v1948_v30  ;;  %1712 = vrot.lane.b32.xlu1 %v1711_v53, %s1790_s15  ;;  %1717 = vrot.lane.b32.xlu0 %v1716_v54, %s1791_s16 }
 0x120   : > { %v807_v60 = vpop.f32.mrf.mxu0 }
 0x121   : > { %v1721_v61 = vpack.i.bf16 %v866_v57, %v864_v58  ;;  %v808_v62 = vadd.f32 %v1948_v30, %v807_v60  ;;  %v867_v0 = vmax.f32 %v816_v59, 0.0 }
 0x122   : > { %v1624_v63 = vpop.f32.mrf.mxu0 }
 0x123   : > { %v865_v1 = vmax.f32 %v808_v62, 0.0  ;;  %1722 = vrot.lane.b32.xlu0 %v1721_v61, %s1792_s17 }
 0x124   : > { %v820_v2 = vpop.f32.mrf.mxu0 }
 0x125   : > { %v1726_v3 = vpack.i.bf16 %v867_v0, %v865_v1  ;;  %v821_v4 = vadd.f32 %v1948_v30, %v820_v2 }
 0x126   : > { %v1625_v5 = vpop.f32.mrf.mxu0 }
 0x127   : > { %v868_v6 = vmax.f32 %v821_v4, 0.0  ;;  %1727 = vrot.lane.b32.xlu1 %v1726_v3, %s1793_s19 }
 0x128   : > { %v823_v7 = vpop.f32.mrf.mxu0 }
 0x129   : > { %v1014_v8 = vpack.c.bf16 %v868_v6, %v866_v57 }
 0x169   : > { %v1663_v9 = vpop.permute.xlu0 %1662 }
 0x16a   : > { %v1665_v15 = vunpack.i.h.bf16 %v1663_v9  ;;  %v1664_v16 = vunpack.i.l.bf16 %v1663_v9 }
 0x16c   : > { %v938_v24 = vsel %vm897_vm2, %v846_v48, %v1665_v15  ;;  %v898_v25 = vsel %vm897_vm2, %v844_v20, %v1664_v16 }
 0x16d   : > { %v1668_v12 = vpop.permute.xlu0 %1667 }
 0x16e   : > { %v1670_v17 = vunpack.i.h.bf16 %v1668_v12  ;;  %v1669_v18 = vunpack.i.l.bf16 %v1668_v12 }
 0x170   : > { %v900_v27 = vsel %vm899_vm3, %v898_v25, %v1669_v18  ;;  %v939_v28 = vsel %vm899_vm3, %v938_v24, %v1670_v17  ;;  %v1766_v24 = vld [vmem:[%s2162_s6 + $0x20] sm:$0xff]  }
 0x171   : > { %v1517_v25 = vld [vmem:[%s2161_s5] ss:$0 sm:$0xff] }
 0x175   : > { %v1673_v10 = vpop.permute.xlu1 %1672  ;;  %v1678_v29 = vpop.permute.xlu0 %1677 }
 0x176   : > { %v1675_v21 = vunpack.i.h.bf16 %v1673_v10  ;;  %v1674_v22 = vunpack.i.l.bf16 %v1673_v10  ;;  %v1680_v36 = vunpack.i.h.bf16 %v1678_v29  ;;  %v1679_v37 = vunpack.i.l.bf16 %v1678_v29 }
 0x178   : > { %v902_v32 = vsel %vm901_vm4, %v900_v27, %v1674_v22  ;;  %v940_v33 = vsel %vm901_vm4, %v939_v28, %v1675_v21  ;;  %v1763_v22 = vld [vmem:[%s2162_s6 + $0x38] sm:$0xff]  }
 0x179   : > { %v1683_v19 = vpop.permute.xlu1 %1682  ;;  %v1767_v28 = vld [vmem:[%s2162_s6 + $0x18] sm:$0xff]  }
 0x17a   : > { %v1685_v30 = vunpack.i.h.bf16 %v1683_v19  ;;  %v1684_v23 = vunpack.i.l.bf16 %v1683_v19 }
 0x17c   : > { %v904_v34 = vsel %vm903_vm5, %v902_v32, %v1684_v23  ;;  %v941_v40 = vsel %vm903_vm5, %v940_v33, %v1685_v30  ;;  %v1764_v30 = vld [vmem:[%s2162_s6 + $0x30] sm:$0xff]   ;;  %v1765_v23 = vld [vmem:[%s2162_s6 + $0x28] sm:$0xff]  }
 0x17d   : > { %v1688_v31 = vpop.permute.xlu1 %1687  ;;  %v906_v39 = vsel %vm905_vm6, %v904_v34, %v1679_v37  ;;  %v942_v41 = vsel %vm905_vm6, %v941_v40, %v1680_v36  ;;  %v1768_v33 = vld [vmem:[%s2162_s6 + $0x10] sm:$0xff]   ;;  %v1770_v36 = vld [vmem:[%s2162_s6] sm:$0xff]  }
 0x17e   : > { %v1690_v35 = vunpack.i.h.bf16 %v1688_v31  ;;  %v1689_v48 = vunpack.i.l.bf16 %v1688_v31  ;;  %v1771_v37 = vld [vmem:[%s2162_s6 + $0x40] ss:$0 sps:$4 sm:$0xff]  }
 0x180   : > { %v908_v44 = vsel %vm907_vm7, %v906_v39, %v1689_v48  ;;  %v943_v45 = vsel %vm907_vm7, %v942_v41, %v1690_v35  ;;  %v1769_v48 = vld [vmem:[%s2162_s6 + $0x8] sm:$0xff]  }
 0x181   : > { %v1693_v38 = vpop.permute.xlu0 %1692  ;;  %v1698_v50 = vpop.permute.xlu1 %1697 }
 0x182   : > { %v1695_v42 = vunpack.i.h.bf16 %v1693_v38  ;;  %v1694_v43 = vunpack.i.l.bf16 %v1693_v38  ;;  %v1700_v53 = vunpack.i.h.bf16 %v1698_v50  ;;  %v1699_v54 = vunpack.i.l.bf16 %v1698_v50 }
 0x183   : > { %v1252_v38 = vsel %vm1250_vm9, %v1771_v37, 0 }
 0x184   : > { %v910_v46 = vsel %vm909_vm8, %v908_v44, %v1694_v43  ;;  %v944_v47 = vsel %vm909_vm8, %v943_v45, %v1695_v42  ;;  %v1004_v63 = vsel %vm897_vm2, %v2000_v13, %v1700_v53  ;;  %v971_v0 = vsel %vm897_vm2, %v854_v14, %v1699_v54 }
 0x185   : > { %v1011_v49 = vpack.c.bf16 %v944_v47, %v910_v46  ;;  %v1703_v51 = vpop.permute.xlu0 %1702  ;;  %v1794_v43 = vmov 0.0  }
 0x186   : > { %v1705_v55 = vunpack.i.h.bf16 %v1703_v51  ;;  %v1704_v56 = vunpack.i.l.bf16 %v1703_v51 }
 0x187   : > { %1133 = vmatmul.mubr.bf16.vlgmr.msra.gmra.mxu1 %v1011_v49 }
 0x188   : > { %1528 = vmatprep.mubr.msk.bf16.mxu1 %vm897_vm2, %v1014_v8  ;;  %v1005_v1 = vsel %vm899_vm3, %v1004_v63, %v1705_v55  ;;  %v972_v2 = vsel %vm899_vm3, %v971_v0, %v1704_v56  ;;  %1255 = vmatpush1.bf16.msra.mxu1 %v1763_v22  ;;  %v1776_v63 = vld [vmem:[%s1890_s18 + $0x80] sm:$0xff]   ;;  %v1777_v0 = vld [vmem:[%s1890_s18 + $0x88] sm:$0xff]  }
 0x189   : > { %1256 = vmatprep.subr.bf16.mxu1 %v1786_v26  ;;  %1626 = vmatprep.mubr.msk.bf16.mxu0 %vm619_vm1, %v1776_v63 }
 0x18a   : > { %1627 = vmatmul.mubr.msk.bf16.gmra.mxu0 %vm619_vm1, %v1777_v0 }
 0x18c   : > { %1257 = vmatpush1.bf16.msra.mxu1 %v1764_v30  ;;  %v1547_v30 = vld [vmem:[#allocation2] ss:$0 sm:$0xff] }
 0x18d   : > { %v1708_v52 = vpop.permute.xlu1 %1707  ;;  %1258 = vmatprep.subr.bf16.mxu1 %v1786_v26 }
 0x18e   : > { %v1710_v58 = vunpack.i.h.bf16 %v1708_v52  ;;  %v1709_v59 = vunpack.i.l.bf16 %v1708_v52 }
 0x190   : > { %v973_v4 = vsel %vm901_vm4, %v972_v2, %v1709_v59  ;;  %v1006_v5 = vsel %vm901_vm4, %v1005_v1, %v1710_v58  ;;  %1259 = vmatpush1.bf16.msra.mxu1 %v1765_v23  ;;  %v1772_v58 = vld [vmem:[%s2164_s8 + $0x18] sm:$0xff]   ;;  %v1529_v1 = vld [vmem:[%s2163_s7] ss:$0 sm:$0xff] }
 0x191   : > { %v1718_v57 = vpop.permute.xlu0 %1717  ;;  %v1713_v60 = vpop.permute.xlu1 %1712  ;;  %1260 = vmatprep.subr.bf16.mxu1 %v1786_v26 }
 0x192   : > { %v1720_v61 = vunpack.i.h.bf16 %v1718_v57  ;;  %v1719_v62 = vunpack.i.l.bf16 %v1718_v57  ;;  %v1715_v6 = vunpack.i.h.bf16 %v1713_v60  ;;  %v1714_v7 = vunpack.i.l.bf16 %v1713_v60  ;;  %v1773_v60 = vld [vmem:[%s2164_s8 + $0x10] sm:$0xff]  }
 0x194   : > { %v974_v8 = vsel %vm903_vm5, %v973_v4, %v1719_v62  ;;  %v1007_v9 = vsel %vm903_vm5, %v1006_v5, %v1720_v61  ;;  %1261 = vmatpush1.bf16.msra.mxu1 %v1766_v24  ;;  %v1774_v61 = vld [vmem:[%s2164_s8 + $0x8] sm:$0xff]   ;;  %v1775_v62 = vld [vmem:[%s2164_s8] sm:$0xff]  }
 0x195   : > { %v1723_v3 = vpop.permute.xlu0 %1722  ;;  %v975_v14 = vsel %vm905_vm6, %v974_v8, %v1714_v7  ;;  %v1008_v12 = vsel %vm905_vm6, %v1007_v9, %v1715_v6  ;;  %1262 = vmatprep.subr.bf16.mxu1 %v1786_v26 }
 0x196   : > { %v1725_v13 = vunpack.i.h.bf16 %v1723_v3  ;;  %v1724_v10 = vunpack.i.l.bf16 %v1723_v3 }
 0x198   : > { %v976_v17 = vsel %vm907_vm7, %v975_v14, %v1724_v10  ;;  %v1009_v18 = vsel %vm907_vm7, %v1008_v12, %v1725_v13  ;;  %1263 = vmatpush1.bf16.msra.mxu1 %v1767_v28  ;;  %v1540_v14 = vld [vmem:[%s2165_s9] ss:$0 sm:$0xff] }
 0x199   : > { %v1728_v11 = vpop.permute.xlu1 %1727  ;;  %1264 = vmatprep.subr.bf16.mxu1 %v1786_v26 }
 0x19a   : > { %v1730_v15 = vunpack.i.h.bf16 %v1728_v11  ;;  %v1729_v16 = vunpack.i.l.bf16 %v1728_v11 }
 0x19c   : > { %v977_v19 = vsel %vm909_vm8, %v976_v17, %v1729_v16  ;;  %v1010_v20 = vsel %vm909_vm8, %v1009_v18, %v1730_v15  ;;  %1265 = vmatpush1.bf16.msra.mxu1 %v1768_v33  ;;  %v1546_v17 = vld [vmem:[%s2166_s10] ss:$0 sm:$0xff] }
 0x19d   : > { %v1013_v21 = vpack.c.bf16 %v1010_v20, %v977_v19  ;;  %1266 = vmatprep.subr.bf16.mxu1 %v1786_v26 }
 0x19f   : > { %1141 = vmatmul.mubr.bf16.gmra.mxu1 %v1013_v21 }
 0x1a0   : > { %1267 = vmatpush1.bf16.msra.mxu1 %v1769_v48 }
 0x1a1   : > { %1268 = vmatprep.subr.bf16.mxu1 %v1786_v26 }
 0x1a4   : > { %1269 = vmatpush1.bf16.msra.mxu1 %v1770_v36 }
 0x1a5   : > { %1284 = vmatprep.subr.bf16.mxu1 %v1786_v26 }
 0x1a8   : > { %1285 = vmatpush2.bf16.msra.mxu1 %v1252_v38 }
 0x1a9   : > { %1630 = vmatprep.subr.bf16.mxu1 %v1794_v43 }
 0x247   : > { %v1134_v27 = vpop.f32.mrf.mxu1 }
 0x248   : > { %v1135_v29 = vadd.f32 %v1517_v25, %v1134_v27 }
 0x249   : > { %v1136_v31 = vpop.f32.mrf.mxu1 }
 0x24a   : > { %v1149_v52 = vmax.f32 %v1135_v29, 0.0  ;;  %v1628_v9 = vpop.f32.mrf.mxu0 }
 0x24b   : > { %v1137_v32 = vpop.f32.mrf.mxu1 }
 0x24c   : > { %v1138_v34 = vadd.f32 %v1517_v25, %v1137_v32  ;;  %v833_v13 = vpop.f32.mrf.mxu0 }
 0x24d   : > { %v1139_v40 = vpop.f32.mrf.mxu1 }
 0x24e   : > { %v1150_v35 = vmax.f32 %v1138_v34, 0.0  ;;  %v1629_v10 = vpop.f32.mrf.mxu0 }
 0x250   : > { %1154 = vrot.lane.b32.xlu0 %v1150_v35, %s1788_s27  ;;  %s1471_s27 = sshll.u32 %s2172_s24, 3  ;;  %v835_v11 = vpop.f32.mrf.mxu0 }
 0x251   : > { %s428_s13 = scalar_lea.vmem %s2157_s1, %s1471_s27  ;;  %s432_s14 = scalar_lea.vmem %s2168_s12, %s1471_s27 }
 0x252   : > { %v1168_v39 = vld [vmem:[%s428_s13] sm:$0xff] }
 0x253   : > { %v1170_v41 = vpack.c.bf16 %v1168_v39, %v1168_v39 }
 0x255   : > { %1539 = vmatprep.mubr.msk.bf16.mxu1 %vm1246_vm10, %v1170_v41 }
 0x25f   : > { %v1142_v42 = vpop.f32.mrf.mxu1 }
 0x260   : > { %v1143_v26 = vadd.f32 %v1517_v25, %v1142_v42 }
 0x261   : > { %v1144_v44 = vpop.f32.mrf.mxu1 }
 0x262   : > { %v1151_v45 = vmax.f32 %v1143_v26, 0.0 }
 0x263   : > { %v1145_v46 = vpop.f32.mrf.mxu1 }
 0x264   : > { %v1146_v47 = vadd.f32 %v1517_v25, %v1145_v46  ;;  %1158 = vrot.lane.b32.xlu1 %v1151_v45, %s1791_s16 }
 0x265   : > { %v1147_v49 = vpop.f32.mrf.mxu1 }
 0x266   : > { %v1152_v50 = vmax.f32 %v1146_v47, 0.0 }
 0x268   : > { %1162 = vrot.lane.b32.xlu0 %v1152_v50, %s1792_s17 }
 0x2c2   : > { %v1155_v51 = vpop.permute.xlu0 %1154 }
 0x2c3   : > { %v1165_v54 = vsel %vm899_vm3, %v1149_v52, %v1155_v51 }
 0x2d6   : > { %v1159_v53 = vpop.permute.xlu1 %1158 }
 0x2d7   : > { %v1166_v55 = vsel %vm903_vm5, %v1165_v54, %v1159_v53 }
 0x2da   : > { %v1163_v56 = vpop.permute.xlu0 %1162 }
 0x2db   : > { %v1167_v57 = vsel %vm907_vm7, %v1166_v55, %v1163_v56 }
 0x2dc   : > { %v1169_v59 = vpack.c.bf16 %v1167_v57, %v1167_v57 }
 0x2de   : > { %1287 = vmatmul.mubr.bf16.vlgmr.msra.gmra.mxu1 %v1169_v59 }
 0x2df   : > { %1631 = vmatpush3.bf16.msra.mxu1 %v1772_v58  ;;  %1638 = vmatprep.mubr.msk.bf16.mxu1 %vm1795_vm11, %v1794_v43 }
 0x2e0   : > { %1632 = vmatprep.subr.bf16.mxu1 %v1794_v43 }
 0x2e3   : > { %1633 = vmatpush3.bf16.msra.mxu1 %v1773_v60 }
 0x2e4   : > { %1634 = vmatprep.subr.bf16.mxu1 %v1794_v43 }
 0x2e7   : > { %1635 = vmatpush3.bf16.msra.mxu1 %v1774_v61 }
 0x2e8   : > { %1636 = vmatprep.subr.bf16.mxu1 %v1794_v43 }
 0x2eb   : > { %1637 = vmatpush3.bf16.msra.mxu1 %v1775_v62 }
 0x39e   : > { %v1288_v2 = vpop.f32.mrf.mxu1 }
 0x39f   : > { %v1289_v3 = vadd.f32 %v1529_v1, %v1288_v2 }
 0x3a0   : > { %v1290_v4 = vpop.f32.mrf.mxu1 }
 0x3a1   : > { %v1294_v5 = vmax.f32 %v1289_v3, 0.0 }
 0x3a2   : > { %v1291_v6 = vpop.f32.mrf.mxu1 }
 0x3a3   : > { %v1295_v7 = vpack.c.bf16 %v1294_v5, %v1294_v5 }
 0x3a4   : > { %v1292_v8 = vpop.f32.mrf.mxu1 }
 0x3a5   : > { %1639 = vmatmul.mubr.msk.bf16.vlgmr.msra.gmra.mxu1 %vm903_vm5, %v1295_v7 }
 0x465   : > { %v1372_v12 = vpop.f32.mrf.mxu1 }
 0x466   : > { %v1373_v15 = vadd.f32 %v1540_v14, %v1372_v12 }
 0x467   : > { %v1640_v16 = vpop.f32.mrf.mxu1 }
 0x468   : > { %v1378_v18 = vmax.f32 %v1373_v15, 0.0 }
 0x469   : > { %v1375_v19 = vpop.f32.mrf.mxu1 }
 0x46a   : > { %v1386_v20 = vmul.f32 %v1546_v17, %v1378_v18 }
 0x46b   : > { %v1641_v21 = vpop.f32.mrf.mxu1 }
 0x46c   : > { %v1387_v22 = vsel %vm903_vm5, %v1386_v20, 0.0 }
 0x46d   : > { %1388 = vadd.xlane.f32.xlu1 %v1387_v22 }
 0x4f6   : > { %v1389_v23 = vpop.xlane.xlu1 %1388 }
 0x4f7   : > { %v1397_v24 = vadd.f32 %v1547_v30, %v1389_v23 }
 0x4f9   : > { %1399 = vst.msk [vmem:[%s432_s14] sm:$0xff] %vm1398_vm12, %v1397_v24 }
 0x4fa PF: > { %s24_s23 = sadd.s32 1, %s1784_s23  }
 0x4fb   : > { %p21_p5 = scmp.ge.s32.totalorder %s24_s23, 4  }
 0x4fd   :  { %23 = sbr.rel (!%p21_p5) target bundleno = 3 (0x3), region = 101 }

</bundles_post_ra>
